<compile_context>
chip_gen: v7x
topology: tpu7x:2x2x1
jax: 0.10.0
libtpu: 0.0.40
codegen_flags: <defaults>
</compile_context>

<pallas_src>
import functools

import jax
import jax.numpy as jnp
from jax.experimental import pallas as pl
from jax.experimental.pallas import tpu as pltpu


def _pow(v, p):
    """x**p.  Small integer exponents are unrolled multiplies (constant-folded
    at trace time); zero / non-integer / negative / large exponents fall back
    to an exp/log path (matches x**p for x > 0, NaN for x < 0 non-integer p,
    like the PyTorch reference)."""
    pf = float(p)
    if pf == 0.0:
        return jnp.ones_like(v)
    if pf.is_integer() and 1.0 <= pf <= 8.0:
        out = v
        for _ in range(int(pf) - 1):
            out = out * v
        return out
    return jnp.exp(pf * jnp.log(v))


def _round_up(n: int, m: int) -> int:
    return ((n + m - 1) // m) * m


def _pick_tile(n: int, target: int) -> int:
    """Largest legal tile <= target.  n is either <= target (full extent) or a
    multiple of 256 (after padding), so a multiple-of-256 tile always exists."""
    if n <= target:
        return n
    for cand in (1024, 768, 512, 256):
        if cand <= target and n % cand == 0:
            return cand
    return 256


# ---------------------------------------------------------------------------
# Stage 1: elementwise pre-pass  H = x**h / (x**h + 1)   (once per element)
# ---------------------------------------------------------------------------
def _hill_kernel(x_ref, h_ref, *, h_exp):
    xh = _pow(x_ref[...], h_exp)
    # Exact divide: paid exactly once per element here (the matmul kernel only
    # re-reads the cached result), so its VPU cost is negligible next to the A
    # HBM stream, and the f32 path stays faithful to the reference numerics.
    h_ref[...] = (xh / (xh + 1.0)).astype(h_ref.dtype)


def _hill_prepass(x, out_dtype, h_exp, tr):
    Np, D = x.shape
    kern = functools.partial(_hill_kernel, h_exp=h_exp)
    return pl.pallas_call(
        kern,
        out_shape=jax.ShapeDtypeStruct((Np, D), out_dtype),
        grid_spec=pltpu.PrefetchScalarGridSpec(
            num_scalar_prefetch=0,
            grid=(Np // tr,),
            in_specs=[pl.BlockSpec((tr, D), lambda i: (i, 0))],
            out_specs=pl.BlockSpec((tr, D), lambda i: (i, 0)),
        ),
        compiler_params=pltpu.CompilerParams(
            dimension_semantics=("parallel",)),
    )(x)


# ---------------------------------------------------------------------------
# Stage 2: O_i = -b * x_i**f + sum_k A[i, k] @ H[k]
# ---------------------------------------------------------------------------
def _gene_matmul_kernel(a_ref, h_ref, x_ref, o_ref, *, b, f_exp):
    @pl.when(pl.program_id(1) == 0)
    def _():
        # Initialize the resident output tile with the decay term (once per i).
        o_ref[...] = (-b) * _pow(x_ref[...], f_exp)

    # Pure DMA + MXU stream; f32 accumulation regardless of A/H dtype.
    o_ref[...] += jnp.dot(a_ref[...], h_ref[...],
                          preferred_element_type=jnp.float32)


@functools.partial(jax.jit, static_argnames=("b", "f", "h", "tile_target"))
def gene_dynamics(A, x, *, b=1.0, f=1, h=2, tile_target=None):
    """f = -b*x**f + A @ (x**h/(x**h+1)) via two Pallas kernels.

    The MXU runs in A's dtype: for the halved-HBM fast path on v5e/v6e/v7x,
    cast A to bfloat16 ONCE outside the per-step jitted call / integration
    loop and pass the pre-cast array.  Accumulation is always float32.
    """
    # TODO(synk): the torch.sparse.mm branch (sparse A) has no clean dense
    # Pallas equivalent here; A is treated as dense.
    N, D = x.shape
    assert A.shape == (N, N), "A must be (N, N) matching x's row count"
    assert x.dtype == jnp.float32, "x / output are kept in float32"

    a_dtype = A.dtype
    a_item = jnp.dtype(a_dtype).itemsize
    if tile_target is None:
        # Narrower A -> bigger tiles: keeps per-step A DMA above the ~0.35us
        # fixed grid-step overhead even at v7x's 3.2 TB/s HBM.
        tile_target = 1024 if a_item <= 2 else 512

    # Correctness fallback for awkward N: zero-pad to a multiple of 256.
    # Padded x rows give Hill == 0 and padded A rows/cols are 0, so they add
    # nothing; padded output rows are sliced off.  Callers hitting this path
    # repeatedly should pre-pad A outside the jitted call.
    Np = N if N <= tile_target else _round_up(N, 256)
    if Np != N:
        A = jnp.pad(A, ((0, Np - N), (0, Np - N)))
        x = jnp.pad(x, ((0, Np - N), (0, 0)))

    tm = tk = _pick_tile(Np, tile_target)
    grid = (Np // tm, Np // tk)

    # Stage 1: Hill term, computed once and emitted in the MXU dtype.
    H = _hill_prepass(x, a_dtype, h, tm)

    # VMEM budget: double-buffered A/H/x tiles + output tile.  With tiles
    # capped at 1024 this is a few MiB — far under v7x's 64 MiB — but clamp
    # the scoped limit to physical capacity anyway.
    vmem_est = (2 * tm * tk * a_item + 2 * tk * D * a_item
                + 2 * tm * D * 4 + 2 * tm * D * 4)
    try:
        vmem_cap = int(pltpu.get_tpu_info().vmem_capacity_bytes)
    except Exception:  # conservative default = v7x per-core capacity
        vmem_cap = 64 * 1024 * 1024
    vmem_limit = min(max(32 * 1024 * 1024, 2 * vmem_est), (vmem_cap * 3) // 4)

    cost = pl.CostEstimate(
        flops=2 * Np * Np * D,
        transcendentals=0,
        bytes_accessed=Np * Np * a_item + Np * D * (a_item + 8),
    )

    kern = functools.partial(_gene_matmul_kernel, b=float(b), f_exp=f)

    out = pl.pallas_call(
        kern,
        out_shape=jax.ShapeDtypeStruct((Np, D), jnp.float32),
        grid_spec=pltpu.PrefetchScalarGridSpec(
            num_scalar_prefetch=0,
            grid=grid,
            in_specs=[
                pl.BlockSpec((tm, tk), lambda i, k: (i, k)),  # A tile
                pl.BlockSpec((tk, D), lambda i, k: (k, 0)),   # Hill tile
                pl.BlockSpec((tm, D), lambda i, k: (i, 0)),   # x row tile
            ],
            out_specs=pl.BlockSpec((tm, D), lambda i, k: (i, 0)),
        ),
        compiler_params=pltpu.CompilerParams(
            dimension_semantics=("parallel", "arbitrary"),
            vmem_limit_bytes=vmem_limit,
        ),
        cost_estimate=cost,
    )(A, H, x)

    return out[:N] if Np != N else out


def gene_dynamics_ref(A, x, b=1.0, f=1, h=2):
    """Pure-JAX reference, mirroring the PyTorch forward exactly."""
    xh = x ** h
    return -b * (x ** f) + A.astype(jnp.float32) @ (xh / (xh + 1.0))


if __name__ == "__main__":
    # Small shapes consistent with the module: x is (n, dim), A is (n, n).
    N, D = 256, 128

    key = jax.random.PRNGKey(0)
    k_a, k_x = jax.random.split(key)
    # Deterministic synthetic adjacency matrix A (the module's only "parameter").
    A = jax.random.uniform(k_a, (N, N), dtype=jnp.float32)
    # Initial state x (non-negative, as typical for gene-expression dynamics).
    x = jax.random.uniform(k_x, (N, D), dtype=jnp.float32)

    ref = gene_dynamics_ref(A, x)

    # f32 MXU path: numerics faithful to the PyTorch module.
    out = jax.block_until_ready(gene_dynamics(A, x))
    if not jnp.allclose(out, ref, rtol=1e-5, atol=1e-5):
        raise AssertionError("Pallas kernel (f32) output mismatch vs reference")

    # Reduced-precision fast path: cast A ONCE, outside the jitted per-step
    # call (exactly what an integrator loop should do), then reuse it.
    A_bf16 = A.astype(jnp.bfloat16)
    out_bf16 = jax.block_until_ready(gene_dynamics(A_bf16, x))
    if not jnp.allclose(out_bf16, ref, rtol=2e-2, atol=2e-2):
        raise AssertionError("Pallas kernel (bf16-A) output mismatch vs reference")

    print("KERNEL_OK")
</pallas_src>

<mosaic_0001>
module attributes {stable_mosaic.version = 11 : i64} {
  func.func @_hill_kernel(%arg0: i32, %arg1: memref<256x128xf32, #tpu.memory_space<vmem>>, %arg2: memref<256x128xf32, #tpu.memory_space<vmem>>) attributes {dimension_semantics = [#tpu.dimension_semantics<parallel>], iteration_bounds = array<i64: 1>, scalar_prefetch = 0 : i64, scratch_operands = 0 : i64, tpu.core_type = #tpu.core_type<tc>, window_params = [{transform_indices = @transform_0, window_bounds = array<i64: 256, 128>}, {transform_indices = @transform_1, window_bounds = array<i64: 256, 128>}]} {
    %c0 = arith.constant 0 : index
    %c0_0 = arith.constant 0 : index
    %0 = vector.load %arg1[%c0, %c0_0] : memref<256x128xf32, #tpu.memory_space<vmem>>, vector<256x128xf32>
    %1 = arith.mulf %0, %0 : vector<256x128xf32>
    %cst = arith.constant 1.000000e+00 : f32
    %2 = vector.broadcast %cst : f32 to vector<256x128xf32>
    %3 = arith.addf %1, %2 : vector<256x128xf32>
    %4 = arith.divf %1, %3 : vector<256x128xf32>
    %c0_1 = arith.constant 0 : index
    %c0_2 = arith.constant 0 : index
    %5 = vector.load %arg2[%c0_1, %c0_2] : memref<256x128xf32, #tpu.memory_space<vmem>>, vector<256x128xf32>
    tpu.vector_store %arg2[%c0_1, %c0_2], %4 {strides = array<i32>} : memref<256x128xf32, #tpu.memory_space<vmem>>, vector<256x128xf32>,
    return
  }
  func.func @transform_0(%arg0: i32) -> (i32, i32) {
    %c0_i32 = arith.constant 0 : i32
    %c0_i32_0 = arith.constant 0 : i32
    return %arg0, %c0_i32 : i32, i32
  }
  func.func @transform_1(%arg0: i32) -> (i32, i32) {
    %c0_i32 = arith.constant 0 : i32
    %c0_i32_0 = arith.constant 0 : i32
    return %arg0, %c0_i32 : i32, i32
  }
}

module attributes {stable_mosaic.version = 11 : i64} {
  func.func @_gene_matmul_kernel(%arg0: i32, %arg1: i32, %arg2: memref<256x256xf32, #tpu.memory_space<vmem>>, %arg3: memref<256x128xf32, #tpu.memory_space<vmem>>, %arg4: memref<256x128xf32, #tpu.memory_space<vmem>>, %arg5: memref<256x128xf32, #tpu.memory_space<vmem>>) attributes {dimension_semantics = [#tpu.dimension_semantics<parallel>, #tpu.dimension_semantics<arbitrary>], iteration_bounds = array<i64: 1, 1>, scalar_prefetch = 0 : i64, scratch_operands = 0 : i64, tpu.core_type = #tpu.core_type<tc>, window_params = [{transform_indices = @transform_0, window_bounds = array<i64: 256, 256>}, {transform_indices = @transform_1, window_bounds = array<i64: 256, 128>}, {transform_indices = @transform_2, window_bounds = array<i64: 256, 128>}, {transform_indices = @transform_3, window_bounds = array<i64: 256, 128>}]} {
    %c0_i32 = arith.constant 0 : i32
    %0 = arith.cmpi eq, %arg1, %c0_i32 : i32
    %1 = arith.extui %0 : i1 to i32
    %c0_i32_0 = arith.constant 0 : i32
    %2 = arith.cmpi ne, %1, %c0_i32_0 : i32
    scf.if %2 {
      %c0_8 = arith.constant 0 : index
      %c0_9 = arith.constant 0 : index
      %9 = vector.load %arg4[%c0_8, %c0_9] : memref<256x128xf32, #tpu.memory_space<vmem>>, vector<256x128xf32>
      %cst_10 = arith.constant -1.000000e+00 : f32
      %10 = vector.broadcast %cst_10 : f32 to vector<256x128xf32>
      %11 = arith.mulf %10, %9 : vector<256x128xf32>
      %c0_11 = arith.constant 0 : index
      %c0_12 = arith.constant 0 : index
      %12 = vector.load %arg5[%c0_11, %c0_12] : memref<256x128xf32, #tpu.memory_space<vmem>>, vector<256x128xf32>
      tpu.vector_store %arg5[%c0_11, %c0_12], %11 {strides = array<i32>} : memref<256x128xf32, #tpu.memory_space<vmem>>, vector<256x128xf32>,
    } else {
    }
    %c0 = arith.constant 0 : index
    %c0_1 = arith.constant 0 : index
    %3 = vector.load %arg5[%c0, %c0_1] : memref<256x128xf32, #tpu.memory_space<vmem>>, vector<256x128xf32>
    %c0_2 = arith.constant 0 : index
    %c0_3 = arith.constant 0 : index
    %4 = vector.load %arg2[%c0_2, %c0_3] : memref<256x256xf32, #tpu.memory_space<vmem>>, vector<256x256xf32>
    %c0_4 = arith.constant 0 : index
    %c0_5 = arith.constant 0 : index
    %5 = vector.load %arg3[%c0_4, %c0_5] : memref<256x128xf32, #tpu.memory_space<vmem>>, vector<256x128xf32>
    %cst = arith.constant dense<0.000000e+00> : vector<256x128xf32>
    %6 = tpu.matmul %4, %5, %cst {dimension_numbers = #tpu.dot_dimension_numbers<[1], [0], [0], [1], [0, 0, 1, 1], [], []>} : vector<256x256xf32>, vector<256x128xf32>, vector<256x128xf32> -> vector<256x128xf32>
    %7 = arith.addf %3, %6 : vector<256x128xf32>
    %c0_6 = arith.constant 0 : index
    %c0_7 = arith.constant 0 : index
    %8 = vector.load %arg5[%c0_6, %c0_7] : memref<256x128xf32, #tpu.memory_space<vmem>>, vector<256x128xf32>
    tpu.vector_store %arg5[%c0_6, %c0_7], %7 {strides = array<i32>} : memref<256x128xf32, #tpu.memory_space<vmem>>, vector<256x128xf32>,
    return
  }
  func.func @transform_0(%arg0: i32, %arg1: i32) -> (i32, i32) {
    %c0_i32 = arith.constant 0 : i32
    return %arg0, %arg1 : i32, i32
  }
  func.func @transform_1(%arg0: i32, %arg1: i32) -> (i32, i32) {
    %c0_i32 = arith.constant 0 : i32
    %c0_i32_0 = arith.constant 0 : i32
    return %arg1, %c0_i32 : i32, i32
  }
  func.func @transform_2(%arg0: i32, %arg1: i32) -> (i32, i32) {
    %c0_i32 = arith.constant 0 : i32
    %c0_i32_0 = arith.constant 0 : i32
    return %arg0, %c0_i32 : i32, i32
  }
  func.func @transform_3(%arg0: i32, %arg1: i32) -> (i32, i32) {
    %c0_i32 = arith.constant 0 : i32
    %c0_i32_0 = arith.constant 0 : i32
    return %arg0, %c0_i32 : i32, i32
  }
}

</mosaic_0001>

<bundles_post_ra>
// kernel: gene_dynamics.2
= control target key start
LH: loop header
LB: loop body
LE: loop exit
PB: predicated region body
PF: predicated region fallthrough
CT: control target
= control target key end

     0   :  { %6 = vsyncpa [#allocation3], 0  ;;  %s310_s6 = smov [#allocation2]   ;;  %s559_s0 = inlined_call_operand.hbm [shape: f32[256,128], index: 0, kind: input, shape index: {}]   ;;  %s560_s1 = inlined_call_operand.vmem [shape: f32[256,128], index: 1, kind: output, shape index: {}]  }
   0x1   :  { %s12_s7 = sshll.u32 %s310_s6, 4  ;;  %s286_s10 = scalar_lea.hbm %s559_s0, 4096  ;;  %s13_s7 = int_to_ptr.vmem [resolvable:$true] %s12_s7 }
   0x2   :  { %p287_p0 = scmp.ne.s32.totalorder %s559_s0, %s286_s10  ;;  %p290_p1 = scmp.lt.u32.totalorder %s286_s10, %s559_s0 }
   0x4   :  { %p292_p2 = pnand %p290_p1, %p287_p0 }
   0x6   :  { %295 = shalt.err (!%p292_p2)
}
   0x7   :  { %s296_s15 = scalar_lea.vmem %s13_s7, 4096  ;;  %p301_p4 = scmp.lt.s32.totalorder %s13_s7, %s13_s7 }
   0x8   :  { %p297_p3 = scmp.ne.s32.totalorder %s13_s7, %s296_s15  ;;  %p302_p5 = scmp.lt.s32.totalorder %s296_s15, %s296_s15 }
   0xa   :  { %p303_p6 = por %p302_p5, %p301_p4 }
   0xc   :  { %p304_p7 = pnand %p303_p6, %p297_p3 }
   0xe   :  { %307 = shalt.err (!%p304_p7)
}
   0xf   :  { %s311_s16 = smov 128   ;;  %s312_s17 = smov 8  }
  0x10   :  { %18 = dma.hbm_to_vmem [thread:$0]  %s559_s0, 4096, %s13_s7, [#allocation3], %s311_s16, %s311_s16, %s312_s17  }
  0x11   :  { %308 = dma.done.wait [#allocation3], 4096  }
  0x12   :  { %309 = vsyncadd [#allocation3], 4294963200  ;;  %v22_v0 = vld [vmem:[#allocation2] sm:$0xff]  ;;  %v23_v1 = vld [vmem:[#allocation2 + $0x8] sm:$0xff] }
  0x13   :  { %v24_v2 = vld [vmem:[#allocation2 + $0x10] sm:$0xff]  ;;  %v335_v3 = vmul.f32 %v22_v0, %v22_v0  ;;  %v337_v4 = vmul.f32 %v23_v1, %v23_v1  ;;  %v25_v6 = vld [vmem:[#allocation2 + $0x18] sm:$0xff]  ;;  %v26_v7 = vld [vmem:[#allocation2 + $0x20] sm:$0xff] }
  0x14   :  { %v339_v5 = vmul.f32 %v24_v2, %v24_v2  ;;  %v27_v8 = vld [vmem:[#allocation2 + $0x28] sm:$0xff]  ;;  %v341_v9 = vmul.f32 %v25_v6, %v25_v6  ;;  %v343_v10 = vmul.f32 %v26_v7, %v26_v7  ;;  %v28_v12 = vld [vmem:[#allocation2 + $0x30] sm:$0xff]  ;;  %v29_v13 = vld [vmem:[#allocation2 + $0x38] sm:$0xff] }
  0x15   :  { %v345_v11 = vmul.f32 %v27_v8, %v27_v8  ;;  %v30_v14 = vld [vmem:[#allocation2 + $0x40] sm:$0xff]  ;;  %v86_v15 = vadd.f32 1.0, %v335_v3  ;;  %v87_v16 = vadd.f32 1.0, %v337_v4  ;;  %v350_v18 = vmul.f32 %v28_v12, %v28_v12  ;;  %v31_v19 = vld [vmem:[#allocation2 + $0x48] sm:$0xff]  ;;  %v32_v22 = vld [vmem:[#allocation2 + $0x50] sm:$0xff] }
  0x16   :  { %v88_v17 = vadd.f32 1.0, %v339_v5  ;;  %v89_v20 = vadd.f32 1.0, %v341_v9  ;;  %v353_v21 = vmul.f32 %v29_v13, %v29_v13  ;;  %v90_v23 = vadd.f32 1.0, %v343_v10  ;;  %v33_v25 = vld [vmem:[#allocation2 + $0x58] sm:$0xff]  ;;  %v34_v28 = vld [vmem:[#allocation2 + $0x60] sm:$0xff]  ;;  %v35_v31 = vld [vmem:[#allocation2 + $0x68] sm:$0xff] }
  0x17   :  { %222 = vrcp.f32 %v86_v15  ;;  %v356_v24 = vmul.f32 %v30_v14, %v30_v14  ;;  %v91_v26 = vadd.f32 1.0, %v345_v11  ;;  %v359_v27 = vmul.f32 %v31_v19, %v31_v19  ;;  %v36_v34 = vld [vmem:[#allocation2 + $0x70] sm:$0xff]  ;;  %v37_v37 = vld [vmem:[#allocation2 + $0x78] sm:$0xff]  ;;  %v38_v40 = vld [vmem:[#allocation2 + $0x80] sm:$0xff] }
  0x18   :  { %224 = vrcp.f32 %v87_v16  ;;  %v92_v29 = vadd.f32 1.0, %v350_v18  ;;  %v362_v30 = vmul.f32 %v32_v22, %v32_v22  ;;  %v93_v32 = vadd.f32 1.0, %v353_v21  ;;  %v39_v43 = vld [vmem:[#allocation2 + $0x88] sm:$0xff]  ;;  %v40_v46 = vld [vmem:[#allocation2 + $0x90] sm:$0xff]  ;;  %v41_v49 = vld [vmem:[#allocation2 + $0x98] sm:$0xff] }
  0x19   :  { %226 = vrcp.f32 %v88_v17  ;;  %v365_v33 = vmul.f32 %v33_v25, %v33_v25  ;;  %v94_v35 = vadd.f32 1.0, %v356_v24  ;;  %v368_v36 = vmul.f32 %v34_v28, %v34_v28  ;;  %v42_v52 = vld [vmem:[#allocation2 + $0xa0] sm:$0xff]  ;;  %v43_v56 = vld [vmem:[#allocation2 + $0xa8] sm:$0xff]  ;;  %v44_v61 = vld [vmem:[#allocation2 + $0xb0] sm:$0xff] }
  0x1a   :  { %228 = vrcp.f32 %v89_v20  ;;  %v95_v38 = vadd.f32 1.0, %v359_v27  ;;  %v371_v39 = vmul.f32 %v35_v31, %v35_v31  ;;  %v96_v41 = vadd.f32 1.0, %v362_v30  ;;  %v45_v2 = vld [vmem:[#allocation2 + $0xb8] sm:$0xff]  ;;  %v46_v12 = vld [vmem:[#allocation2 + $0xc0] sm:$0xff]  ;;  %v47_v16 = vld [vmem:[#allocation2 + $0xc8] sm:$0xff] }
  0x1b   :  { %230 = vrcp.f32 %v90_v23  ;;  %v374_v42 = vmul.f32 %v36_v34, %v36_v34  ;;  %v97_v44 = vadd.f32 1.0, %v365_v33  ;;  %v377_v45 = vmul.f32 %v37_v37, %v37_v37  ;;  %v48_v22 = vld [vmem:[#allocation2 + $0xd0] sm:$0xff]  ;;  %v49_v28 = vld [vmem:[#allocation2 + $0xd8] sm:$0xff]  ;;  %v50_v34 = vld [vmem:[#allocation2 + $0xe0] sm:$0xff] }
  0x1c   :  { %232 = vrcp.f32 %v91_v26  ;;  %v98_v47 = vadd.f32 1.0, %v368_v36  ;;  %v380_v48 = vmul.f32 %v38_v40, %v38_v40  ;;  %v99_v50 = vadd.f32 1.0, %v371_v39  ;;  %v51_v40 = vld [vmem:[#allocation2 + $0xe8] sm:$0xff] }
  0x1d   :  { %234 = vrcp.f32 %v92_v29  ;;  %v383_v51 = vmul.f32 %v39_v43, %v39_v43  ;;  %v100_v54 = vadd.f32 1.0, %v374_v42  ;;  %v386_v55 = vmul.f32 %v40_v46, %v40_v46  ;;  %v52_v46 = vld [vmem:[#allocation2 + $0xf0] sm:$0xff] }
  0x1e   :  { %236 = vrcp.f32 %v93_v32  ;;  %v101_v59 = vadd.f32 1.0, %v377_v45  ;;  %v390_v60 = vmul.f32 %v41_v49, %v41_v49  ;;  %v102_v0 = vadd.f32 1.0, %v380_v48 }
  0x1f   :  { %238 = vrcp.f32 %v94_v35  ;;  %v394_v1 = vmul.f32 %v42_v52, %v42_v52  ;;  %v103_v7 = vadd.f32 1.0, %v383_v51  ;;  %v401_v8 = vmul.f32 %v43_v56, %v43_v56  ;;  %v53_v52 = vld [vmem:[#allocation2 + $0xf8] sm:$0xff] }
  0x20   :  { %240 = vrcp.f32 %v95_v38  ;;  %v104_v14 = vadd.f32 1.0, %v386_v55  ;;  %v408_v15 = vmul.f32 %v44_v61, %v44_v61  ;;  %v105_v19 = vadd.f32 1.0, %v390_v60 }
  0x21   :  { %v223_v53 = vpop.eup %222  ;;  %242 = vrcp.f32 %v96_v41  ;;  %v415_v20 = vmul.f32 %v45_v2, %v45_v2  ;;  %v106_v25 = vadd.f32 1.0, %v394_v1  ;;  %v422_v26 = vmul.f32 %v46_v12, %v46_v12 }
  0x22   :  { %v225_v57 = vpop.eup %224  ;;  %v119_v58 = vmul.f32 %v223_v53, %v335_v3  ;;  %244 = vrcp.f32 %v97_v44  ;;  %v107_v31 = vadd.f32 1.0, %v401_v8  ;;  %v429_v32 = vmul.f32 %v47_v16, %v47_v16 }
  0x23   :  { %v227_v62 = vpop.eup %226  ;;  %v121_v63 = vmul.f32 %v225_v57, %v337_v4  ;;  %246 = vrcp.f32 %v98_v47  ;;  %v108_v37 = vadd.f32 1.0, %v408_v15  ;;  %v436_v38 = vmul.f32 %v48_v22, %v48_v22 }
  0x24   :  { %v229_v6 = vpop.eup %228  ;;  %182 = vst [vmem:[%s560_s1] sm:$0xff] %v119_v58  ;;  %v123_v3 = vmul.f32 %v227_v62, %v339_v5  ;;  %248 = vrcp.f32 %v99_v50  ;;  %v109_v43 = vadd.f32 1.0, %v415_v20  ;;  %v443_v44 = vmul.f32 %v49_v28, %v49_v28 }
  0x25   :  { %v231_v4 = vpop.eup %230  ;;  %183 = vst [vmem:[%s560_s1 + $0x8] sm:$0xff] %v121_v63  ;;  %v125_v13 = vmul.f32 %v229_v6, %v341_v9  ;;  %250 = vrcp.f32 %v100_v54  ;;  %v110_v49 = vadd.f32 1.0, %v422_v26  ;;  %v450_v50 = vmul.f32 %v50_v34, %v50_v34 }
  0x26   :  { %v233_v5 = vpop.eup %232  ;;  %184 = vst [vmem:[%s560_s1 + $0x10] sm:$0xff] %v123_v3  ;;  %v127_v17 = vmul.f32 %v231_v4, %v343_v10  ;;  %252 = vrcp.f32 %v101_v59  ;;  %v111_v54 = vadd.f32 1.0, %v429_v32  ;;  %v457_v56 = vmul.f32 %v51_v40, %v51_v40 }
  0x27   :  { %v235_v9 = vpop.eup %234  ;;  %185 = vst [vmem:[%s560_s1 + $0x18] sm:$0xff] %v125_v13  ;;  %v129_v23 = vmul.f32 %v233_v5, %v345_v11  ;;  %254 = vrcp.f32 %v102_v0  ;;  %v112_v58 = vadd.f32 1.0, %v436_v38  ;;  %v464_v59 = vmul.f32 %v52_v46, %v52_v46 }
  0x28   :  { %v237_v10 = vpop.eup %236  ;;  %186 = vst [vmem:[%s560_s1 + $0x20] sm:$0xff] %v127_v17  ;;  %v131_v29 = vmul.f32 %v235_v9, %v350_v18  ;;  %256 = vrcp.f32 %v103_v7  ;;  %v113_v62 = vadd.f32 1.0, %v443_v44  ;;  %v471_v63 = vmul.f32 %v53_v52, %v53_v52 }
  0x29   :  { %v239_v11 = vpop.eup %238  ;;  %187 = vst [vmem:[%s560_s1 + $0x28] sm:$0xff] %v129_v23  ;;  %v133_v35 = vmul.f32 %v237_v10, %v353_v21  ;;  %258 = vrcp.f32 %v104_v14  ;;  %v114_v2 = vadd.f32 1.0, %v450_v50  ;;  %v115_v3 = vadd.f32 1.0, %v457_v56 }
  0x2a   :  { %v241_v18 = vpop.eup %240  ;;  %188 = vst [vmem:[%s560_s1 + $0x30] sm:$0xff] %v131_v29  ;;  %v135_v41 = vmul.f32 %v239_v11, %v356_v24  ;;  %260 = vrcp.f32 %v105_v19  ;;  %v116_v12 = vadd.f32 1.0, %v464_v59  ;;  %v117_v13 = vadd.f32 1.0, %v471_v63 }
  0x2b   :  { %v243_v21 = vpop.eup %242  ;;  %189 = vst [vmem:[%s560_s1 + $0x38] sm:$0xff] %v133_v35  ;;  %v137_v47 = vmul.f32 %v241_v18, %v359_v27  ;;  %262 = vrcp.f32 %v106_v25 }
  0x2c   :  { %v245_v24 = vpop.eup %244  ;;  %190 = vst [vmem:[%s560_s1 + $0x40] sm:$0xff] %v135_v41  ;;  %v139_v53 = vmul.f32 %v243_v21, %v362_v30  ;;  %264 = vrcp.f32 %v107_v31 }
  0x2d   :  { %v247_v57 = vpop.eup %246  ;;  %191 = vst [vmem:[%s560_s1 + $0x48] sm:$0xff] %v137_v47  ;;  %v141_v27 = vmul.f32 %v245_v24, %v365_v33  ;;  %266 = vrcp.f32 %v108_v37 }
  0x2e   :  { %v249_v61 = vpop.eup %248  ;;  %192 = vst [vmem:[%s560_s1 + $0x50] sm:$0xff] %v139_v53  ;;  %v143_v30 = vmul.f32 %v247_v57, %v368_v36  ;;  %268 = vrcp.f32 %v109_v43 }
  0x2f   :  { %v251_v0 = vpop.eup %250  ;;  %193 = vst [vmem:[%s560_s1 + $0x58] sm:$0xff] %v141_v27  ;;  %v145_v33 = vmul.f32 %v249_v61, %v371_v39  ;;  %270 = vrcp.f32 %v110_v49 }
  0x30   :  { %v253_v6 = vpop.eup %252  ;;  %194 = vst [vmem:[%s560_s1 + $0x60] sm:$0xff] %v143_v30  ;;  %v147_v36 = vmul.f32 %v251_v0, %v374_v42  ;;  %272 = vrcp.f32 %v111_v54 }
  0x31   :  { %v255_v7 = vpop.eup %254  ;;  %195 = vst [vmem:[%s560_s1 + $0x68] sm:$0xff] %v145_v33  ;;  %v149_v39 = vmul.f32 %v253_v6, %v377_v45  ;;  %274 = vrcp.f32 %v112_v58 }
  0x32   :  { %v257_v4 = vpop.eup %256  ;;  %196 = vst [vmem:[%s560_s1 + $0x70] sm:$0xff] %v147_v36  ;;  %v151_v42 = vmul.f32 %v255_v7, %v380_v48  ;;  %276 = vrcp.f32 %v113_v62 }
  0x33   :  { %v259_v14 = vpop.eup %258  ;;  %197 = vst [vmem:[%s560_s1 + $0x78] sm:$0xff] %v149_v39  ;;  %v153_v45 = vmul.f32 %v257_v4, %v383_v51  ;;  %278 = vrcp.f32 %v114_v2 }
  0x34   :  { %v261_v16 = vpop.eup %260  ;;  %198 = vst [vmem:[%s560_s1 + $0x80] sm:$0xff] %v151_v42  ;;  %v155_v5 = vmul.f32 %v259_v14, %v386_v55  ;;  %280 = vrcp.f32 %v115_v3 }
  0x35   :  { %v263_v48 = vpop.eup %262  ;;  %199 = vst [vmem:[%s560_s1 + $0x88] sm:$0xff] %v153_v45  ;;  %v157_v17 = vmul.f32 %v261_v16, %v390_v60  ;;  %282 = vrcp.f32 %v116_v12 }
  0x36   :  { %v265_v19 = vpop.eup %264  ;;  %200 = vst [vmem:[%s560_s1 + $0x90] sm:$0xff] %v155_v5  ;;  %v159_v51 = vmul.f32 %v263_v48, %v394_v1  ;;  %284 = vrcp.f32 %v117_v13 }
  0x37   :  { %v267_v22 = vpop.eup %266  ;;  %201 = vst [vmem:[%s560_s1 + $0x98] sm:$0xff] %v157_v17  ;;  %v161_v55 = vmul.f32 %v265_v19, %v401_v8 }
  0x38   :  { %v269_v9 = vpop.eup %268  ;;  %202 = vst [vmem:[%s560_s1 + $0xa0] sm:$0xff] %v159_v51  ;;  %v163_v60 = vmul.f32 %v267_v22, %v408_v15 }
  0x39   :  { %v271_v23 = vpop.eup %270  ;;  %203 = vst [vmem:[%s560_s1 + $0xa8] sm:$0xff] %v161_v55  ;;  %v165_v1 = vmul.f32 %v269_v9, %v415_v20 }
  0x3a   :  { %v273_v25 = vpop.eup %272  ;;  %204 = vst [vmem:[%s560_s1 + $0xb0] sm:$0xff] %v163_v60  ;;  %v167_v8 = vmul.f32 %v271_v23, %v422_v26 }
  0x3b   :  { %v275_v28 = vpop.eup %274  ;;  %205 = vst [vmem:[%s560_s1 + $0xb8] sm:$0xff] %v165_v1  ;;  %v169_v15 = vmul.f32 %v273_v25, %v429_v32 }
  0x3c   :  { %v277_v10 = vpop.eup %276  ;;  %206 = vst [vmem:[%s560_s1 + $0xc0] sm:$0xff] %v167_v8  ;;  %v171_v20 = vmul.f32 %v275_v28, %v436_v38 }
  0x3d   :  { %v279_v29 = vpop.eup %278  ;;  %207 = vst [vmem:[%s560_s1 + $0xc8] sm:$0xff] %v169_v15  ;;  %v173_v26 = vmul.f32 %v277_v10, %v443_v44 }
  0x3e   :  { %v281_v31 = vpop.eup %280  ;;  %208 = vst [vmem:[%s560_s1 + $0xd0] sm:$0xff] %v171_v20  ;;  %v175_v32 = vmul.f32 %v279_v29, %v450_v50 }
  0x3f   :  { %v283_v34 = vpop.eup %282  ;;  %209 = vst [vmem:[%s560_s1 + $0xd8] sm:$0xff] %v173_v26  ;;  %v177_v11 = vmul.f32 %v281_v31, %v457_v56 }
  0x40   :  { %v285_v35 = vpop.eup %284  ;;  %210 = vst [vmem:[%s560_s1 + $0xe0] sm:$0xff] %v175_v32  ;;  %v179_v37 = vmul.f32 %v283_v34, %v464_v59 }
  0x41   :  { %211 = vst [vmem:[%s560_s1 + $0xe8] sm:$0xff] %v177_v11  ;;  %v181_v38 = vmul.f32 %v285_v35, %v471_v63 }
  0x42   :  { %212 = vst [vmem:[%s560_s1 + $0xf0] sm:$0xff] %v179_v37 }
  0x43   :  { %213 = vst [vmem:[%s560_s1 + $0xf8] sm:$0xff] %v181_v38 }
  0x44   :  { %218 = vsyncpa [#allocation3], 1 }

// kernel: gene_dynamics.3
= control target key start
LH: loop header
LB: loop body
LE: loop exit
PB: predicated region body
PF: predicated region fallthrough
CT: control target
= control target key end

     0   :  { %8 = vsyncpa [#allocation3], 0  ;;  %s973_s0 = inlined_call_operand.hbm [shape: f32[256,256], index: 0, kind: input, shape index: {}]   ;;  %s974_s1 = inlined_call_operand.vmem [shape: f32[256,128], index: 1, kind: input, shape index: {}]   ;;  %s975_s2 = inlined_call_operand.vmem [shape: f32[256,128], index: 2, kind: input, shape index: {}]   ;;  %s976_s3 = inlined_call_operand.hbm [shape: f32[256,128], index: 3, kind: output, shape index: {}]  }
   0x1   :  { %9 = vsyncpa [#allocation4], 0  ;;  %s698_s12 = smov [#allocation2]   ;;  %s650_s16 = scalar_lea.hbm %s973_s0, 8192 }
   0x2   :  { %s15_s13 = sshll.u32 %s698_s12, 4  ;;  %p651_p0 = scmp.ne.s32.totalorder %s973_s0, %s650_s16  ;;  %s16_s13 = int_to_ptr.vmem [resolvable:$true] %s15_s13 }
   0x3   :  { %p654_p1 = scmp.lt.u32.totalorder %s650_s16, %s973_s0 }
   0x5   :  { %p656_p2 = pnand %p654_p1, %p651_p0 }
   0x7   :  { %659 = shalt.err (!%p656_p2)
}
   0x8   :  { %s660_s21 = scalar_lea.vmem %s16_s13, 8192  ;;  %p665_p4 = scmp.lt.s32.totalorder %s16_s13, %s16_s13 }
   0x9   :  { %p661_p3 = scmp.ne.s32.totalorder %s16_s13, %s660_s21  ;;  %p666_p5 = scmp.lt.s32.totalorder %s660_s21, %s660_s21 }
   0xb   :  { %p667_p6 = por %p666_p5, %p665_p4 }
   0xd   :  { %p668_p7 = pnand %p667_p6, %p661_p3 }
   0xf   :  { %671 = shalt.err (!%p668_p7)
}
  0x10   :  { %s699_s22 = smov 256   ;;  %s700_s23 = smov 16  }
  0x11   :  { %21 = dma.hbm_to_vmem [thread:$0]  %s973_s0, 8192, %s16_s13, [#allocation3], %s699_s22, %s699_s22, %s700_s23  }
  0x12   :  { %694 = dma.done.wait [#allocation3], 8192  }
  0x13   :  { %695 = vsyncadd [#allocation3], 4294959104  ;;  %v701_v0 = vmov 0.0|0.0   ;;  %v225_v1 = vld [vmem:[%s974_s1] sm:$0xff]  ;;  %v226_v2 = vld [vmem:[%s974_s1 + $0x8] sm:$0xff]  ;;  %s702_s11 = smov [#allocation5]  }
  0x14   :  { %563 = vmatprep.subr.bf16.mxu0 %v701_v0  ;;  %611 = vmatprep.subr.bf16.mxu1 %v701_v0  ;;  %v227_v3 = vld [vmem:[%s974_s1 + $0x10] sm:$0xff]  ;;  %v564_v4 = vpack.c.bf16 %v226_v2, %v225_v1  ;;  %v228_v5 = vld [vmem:[%s974_s1 + $0x18] sm:$0xff]  ;;  %v229_v7 = vld [vmem:[%s974_s1 + $0x20] sm:$0xff]  ;;  %s551_s12 = sshll.u32 %s702_s11, 4  ;;  %s552_s12 = int_to_ptr.vmem [resolvable:$true] %s551_s12 }
  0x15   :  { %v567_v6 = vpack.c.bf16 %v228_v5, %v227_v3  ;;  %v230_v8 = vld [vmem:[%s974_s1 + $0x28] sm:$0xff]  ;;  %v231_v10 = vld [vmem:[%s974_s1 + $0x30] sm:$0xff]  ;;  %v232_v11 = vld [vmem:[%s974_s1 + $0x38] sm:$0xff]  ;;  %p677_p9 = scmp.lt.s32.totalorder %s552_s12, %s552_s12 }
  0x16   :  { %565 = vmatpush1.bf16.msra.mxu0 %v564_v4  ;;  %627 = vmatpush1.bf16.msra.mxu1 %v564_v4  ;;  %v570_v9 = vpack.c.bf16 %v230_v8, %v229_v7  ;;  %v162_v12 = vld [vmem:[#allocation2 + $0x8] sm:$0xff]  ;;  %v573_v13 = vpack.c.bf16 %v232_v11, %v231_v10  ;;  %v233_v15 = vld [vmem:[%s974_s1 + $0x40] sm:$0xff]  ;;  %v235_v18 = vld [vmem:[%s974_s1 + $0x50] sm:$0xff] }
  0x17   :  { %566 = vmatprep.subr.bf16.mxu0 %v701_v0  ;;  %612 = vmatprep.subr.bf16.mxu1 %v701_v0  ;;  %v194_v14 = vld [vmem:[#allocation2 + $0x108] sm:$0xff]  ;;  %v236_v19 = vld [vmem:[%s974_s1 + $0x58] sm:$0xff]  ;;  %v237_v21 = vld [vmem:[%s974_s1 + $0x60] sm:$0xff] }
  0x18   :  { %v234_v16 = vld [vmem:[%s974_s1 + $0x48] sm:$0xff]  ;;  %321 = vmatprep.mubr.f32.mxu0 %v162_v12  ;;  %401 = vmatprep.mubr.f32.mxu1 %v194_v14  ;;  %v579_v20 = vpack.c.bf16 %v236_v19, %v235_v18  ;;  %v239_v24 = vld [vmem:[%s974_s1 + $0x70] sm:$0xff]  ;;  %v240_v25 = vld [vmem:[%s974_s1 + $0x78] sm:$0xff] }
  0x19   :  { %v576_v17 = vpack.c.bf16 %v234_v16, %v233_v15  ;;  %v238_v22 = vld [vmem:[%s974_s1 + $0x68] sm:$0xff]  ;;  %v585_v26 = vpack.c.bf16 %v240_v25, %v239_v24  ;;  %v241_v27 = vld [vmem:[%s974_s1 + $0x80] sm:$0xff]  ;;  %v243_v30 = vld [vmem:[%s974_s1 + $0x90] sm:$0xff] }
  0x1a   :  { %568 = vmatpush1.bf16.msra.mxu0 %v567_v6  ;;  %628 = vmatpush1.bf16.msra.mxu1 %v567_v6  ;;  %v582_v23 = vpack.c.bf16 %v238_v22, %v237_v21  ;;  %v242_v28 = vld [vmem:[%s974_s1 + $0x88] sm:$0xff]  ;;  %v244_v31 = vld [vmem:[%s974_s1 + $0x98] sm:$0xff]  ;;  %v245_v33 = vld [vmem:[%s974_s1 + $0xa0] sm:$0xff] }
  0x1b   :  { %569 = vmatprep.subr.bf16.mxu0 %v701_v0  ;;  %613 = vmatprep.subr.bf16.mxu1 %v701_v0  ;;  %v588_v29 = vpack.c.bf16 %v242_v28, %v241_v27  ;;  %v591_v32 = vpack.c.bf16 %v244_v31, %v243_v30  ;;  %v246_v34 = vld [vmem:[%s974_s1 + $0xa8] sm:$0xff]  ;;  %v247_v36 = vld [vmem:[%s974_s1 + $0xb0] sm:$0xff]  ;;  %v248_v37 = vld [vmem:[%s974_s1 + $0xb8] sm:$0xff] }
  0x1c   :  { %v594_v35 = vpack.c.bf16 %v246_v34, %v245_v33  ;;  %v597_v38 = vpack.c.bf16 %v248_v37, %v247_v36  ;;  %v249_v39 = vld [vmem:[%s974_s1 + $0xc0] sm:$0xff]  ;;  %v250_v40 = vld [vmem:[%s974_s1 + $0xc8] sm:$0xff]  ;;  %v251_v42 = vld [vmem:[%s974_s1 + $0xd0] sm:$0xff] }
  0x1d   :  { %v600_v41 = vpack.c.bf16 %v250_v40, %v249_v39  ;;  %v252_v43 = vld [vmem:[%s974_s1 + $0xd8] sm:$0xff]  ;;  %v253_v45 = vld [vmem:[%s974_s1 + $0xe0] sm:$0xff]  ;;  %v254_v46 = vld [vmem:[%s974_s1 + $0xe8] sm:$0xff] }
  0x1e   :  { %571 = vmatpush1.bf16.msra.mxu0 %v570_v9  ;;  %629 = vmatpush1.bf16.msra.mxu1 %v570_v9  ;;  %v603_v44 = vpack.c.bf16 %v252_v43, %v251_v42  ;;  %v606_v47 = vpack.c.bf16 %v254_v46, %v253_v45  ;;  %v255_v48 = vld [vmem:[%s974_s1 + $0xf0] sm:$0xff]  ;;  %v256_v49 = vld [vmem:[%s974_s1 + $0xf8] sm:$0xff]  ;;  %v161_v51 = vld [vmem:[#allocation2] sm:$0xff] }
  0x1f   :  { %572 = vmatprep.subr.bf16.mxu0 %v701_v0  ;;  %614 = vmatprep.subr.bf16.mxu1 %v701_v0  ;;  %v609_v50 = vpack.c.bf16 %v256_v49, %v255_v48  ;;  %v193_v52 = vld [vmem:[#allocation2 + $0x100] sm:$0xff]  ;;  %v164_v53 = vld [vmem:[#allocation2 + $0x18] sm:$0xff]  ;;  %v163_v55 = vld [vmem:[#allocation2 + $0x10] sm:$0xff] }
  0x20   :  { %v196_v54 = vld [vmem:[#allocation2 + $0x118] sm:$0xff]  ;;  %v195_v56 = vld [vmem:[#allocation2 + $0x110] sm:$0xff]  ;;  %v166_v57 = vld [vmem:[#allocation2 + $0x28] sm:$0xff] }
  0x21   :  { %v198_v58 = vld [vmem:[#allocation2 + $0x128] sm:$0xff]  ;;  %v165_v59 = vld [vmem:[#allocation2 + $0x20] sm:$0xff]  ;;  %v168_v61 = vld [vmem:[#allocation2 + $0x38] sm:$0xff] }
  0x22   :  { %574 = vmatpush1.bf16.msra.mxu0 %v573_v13  ;;  %630 = vmatpush1.bf16.msra.mxu1 %v573_v13  ;;  %v197_v60 = vld [vmem:[#allocation2 + $0x120] sm:$0xff]  ;;  %v200_v62 = vld [vmem:[#allocation2 + $0x138] sm:$0xff]  ;;  %v167_v63 = vld [vmem:[#allocation2 + $0x30] sm:$0xff] }
  0x23   :  { %575 = vmatprep.subr.bf16.mxu0 %v701_v0  ;;  %615 = vmatprep.subr.bf16.mxu1 %v701_v0  ;;  %v170_v1 = vld [vmem:[#allocation2 + $0x48] sm:$0xff]  ;;  %v169_v3 = vld [vmem:[#allocation2 + $0x40] sm:$0xff]  ;;  %v172_v5 = vld [vmem:[#allocation2 + $0x58] sm:$0xff] }
  0x24   :  { %v202_v2 = vld [vmem:[#allocation2 + $0x148] sm:$0xff]  ;;  %v201_v4 = vld [vmem:[#allocation2 + $0x140] sm:$0xff]  ;;  %v204_v6 = vld [vmem:[#allocation2 + $0x158] sm:$0xff] }
  0x25   :  { %v171_v7 = vld [vmem:[#allocation2 + $0x50] sm:$0xff]  ;;  %v174_v9 = vld [vmem:[#allocation2 + $0x68] sm:$0xff]  ;;  %v173_v11 = vld [vmem:[#allocation2 + $0x60] sm:$0xff] }
  0x26   :  { %577 = vmatpush1.bf16.msra.mxu0 %v576_v17  ;;  %631 = vmatpush1.bf16.msra.mxu1 %v576_v17  ;;  %v203_v8 = vld [vmem:[#allocation2 + $0x150] sm:$0xff]  ;;  %v206_v10 = vld [vmem:[#allocation2 + $0x168] sm:$0xff]  ;;  %v205_v12 = vld [vmem:[#allocation2 + $0x160] sm:$0xff] }
  0x27   :  { %578 = vmatprep.subr.bf16.mxu0 %v701_v0  ;;  %616 = vmatprep.subr.bf16.mxu1 %v701_v0  ;;  %v176_v13 = vld [vmem:[#allocation2 + $0x78] sm:$0xff]  ;;  %v175_v15 = vld [vmem:[#allocation2 + $0x70] sm:$0xff]  ;;  %v178_v17 = vld [vmem:[#allocation2 + $0x88] sm:$0xff] }
  0x28   :  { %v208_v14 = vld [vmem:[#allocation2 + $0x178] sm:$0xff]  ;;  %v207_v16 = vld [vmem:[#allocation2 + $0x170] sm:$0xff]  ;;  %v210_v18 = vld [vmem:[#allocation2 + $0x188] sm:$0xff] }
  0x29   :  { %v177_v19 = vld [vmem:[#allocation2 + $0x80] sm:$0xff]  ;;  %v180_v21 = vld [vmem:[#allocation2 + $0x98] sm:$0xff]  ;;  %v211_v24 = vld [vmem:[#allocation2 + $0x190] sm:$0xff] }
  0x2a   :  { %580 = vmatpush1.bf16.msra.mxu0 %v579_v20  ;;  %632 = vmatpush1.bf16.msra.mxu1 %v579_v20  ;;  %v209_v20 = vld [vmem:[#allocation2 + $0x180] sm:$0xff]  ;;  %v212_v22 = vld [vmem:[#allocation2 + $0x198] sm:$0xff]  ;;  %v182_v25 = vld [vmem:[#allocation2 + $0xa8] sm:$0xff] }
  0x2b   :  { %581 = vmatprep.subr.bf16.mxu0 %v701_v0  ;;  %617 = vmatprep.subr.bf16.mxu1 %v701_v0  ;;  %v181_v27 = vld [vmem:[#allocation2 + $0xa0] sm:$0xff]  ;;  %v216_v30 = vld [vmem:[#allocation2 + $0x1b8] sm:$0xff]  ;;  %v183_v31 = vld [vmem:[#allocation2 + $0xb0] sm:$0xff] }
  0x2c   :  { %v213_v28 = vld [vmem:[#allocation2 + $0x1a0] sm:$0xff]  ;;  %v186_v33 = vld [vmem:[#allocation2 + $0xc8] sm:$0xff]  ;;  %v188_v37 = vld [vmem:[#allocation2 + $0xd8] sm:$0xff] }
  0x2d   :  { %v218_v34 = vld [vmem:[#allocation2 + $0x1c8] sm:$0xff]  ;;  %v217_v36 = vld [vmem:[#allocation2 + $0x1c0] sm:$0xff]  ;;  %v187_v39 = vld [vmem:[#allocation2 + $0xd0] sm:$0xff] }
  0x2e   :  { %583 = vmatpush1.bf16.msra.mxu0 %v582_v23  ;;  %633 = vmatpush1.bf16.msra.mxu1 %v582_v23  ;;  %v179_v23 = vld [vmem:[#allocation2 + $0x90] sm:$0xff]  ;;  %v222_v42 = vld [vmem:[#allocation2 + $0x1e8] sm:$0xff]  ;;  %v189_v43 = vld [vmem:[#allocation2 + $0xe0] sm:$0xff] }
  0x2f   :  { %584 = vmatprep.subr.bf16.mxu0 %v701_v0  ;;  %618 = vmatprep.subr.bf16.mxu1 %v701_v0  ;;  %v219_v40 = vld [vmem:[#allocation2 + $0x1d0] sm:$0xff]  ;;  %v192_v45 = vld [vmem:[#allocation2 + $0xf8] sm:$0xff]  ;;  %v33_v49 = vld [vmem:[%s975_s2] sm:$0xff] }
  0x30   :  { %v224_v46 = vld [vmem:[#allocation2 + $0x1f8] sm:$0xff]  ;;  %v223_v48 = vld [vmem:[#allocation2 + $0x1f0] sm:$0xff] }
  0x32   :  { %586 = vmatpush1.bf16.msra.mxu0 %v585_v26  ;;  %634 = vmatpush1.bf16.msra.mxu1 %v585_v26  ;;  %v214_v26 = vld [vmem:[#allocation2 + $0x1a8] sm:$0xff] }
  0x33   :  { %587 = vmatprep.subr.bf16.mxu0 %v701_v0  ;;  %619 = vmatprep.subr.bf16.mxu1 %v701_v0 }
  0x36   :  { %589 = vmatpush1.bf16.msra.mxu0 %v588_v29  ;;  %635 = vmatpush1.bf16.msra.mxu1 %v588_v29  ;;  %v184_v29 = vld [vmem:[#allocation2 + $0xb8] sm:$0xff] }
  0x37   :  { %590 = vmatprep.subr.bf16.mxu0 %v701_v0  ;;  %620 = vmatprep.subr.bf16.mxu1 %v701_v0 }
  0x3a   :  { %592 = vmatpush1.bf16.msra.mxu0 %v591_v32  ;;  %636 = vmatpush1.bf16.msra.mxu1 %v591_v32  ;;  %v215_v32 = vld [vmem:[#allocation2 + $0x1b0] sm:$0xff] }
  0x3b   :  { %593 = vmatprep.subr.bf16.mxu0 %v701_v0  ;;  %621 = vmatprep.subr.bf16.mxu1 %v701_v0 }
  0x3e   :  { %595 = vmatpush1.bf16.msra.mxu0 %v594_v35  ;;  %637 = vmatpush1.bf16.msra.mxu1 %v594_v35  ;;  %v185_v35 = vld [vmem:[#allocation2 + $0xc0] sm:$0xff] }
  0x3f   :  { %596 = vmatprep.subr.bf16.mxu0 %v701_v0  ;;  %622 = vmatprep.subr.bf16.mxu1 %v701_v0 }
  0x42   :  { %598 = vmatpush1.bf16.msra.mxu0 %v597_v38  ;;  %638 = vmatpush1.bf16.msra.mxu1 %v597_v38  ;;  %v220_v38 = vld [vmem:[#allocation2 + $0x1d8] sm:$0xff] }
  0x43   :  { %599 = vmatprep.subr.bf16.mxu0 %v701_v0  ;;  %623 = vmatprep.subr.bf16.mxu1 %v701_v0 }
  0x46   :  { %601 = vmatpush1.bf16.msra.mxu0 %v600_v41  ;;  %639 = vmatpush1.bf16.msra.mxu1 %v600_v41  ;;  %v190_v41 = vld [vmem:[#allocation2 + $0xe8] sm:$0xff] }
  0x47   :  { %602 = vmatprep.subr.bf16.mxu0 %v701_v0  ;;  %624 = vmatprep.subr.bf16.mxu1 %v701_v0 }
  0x4a   :  { %604 = vmatpush1.bf16.msra.mxu0 %v603_v44  ;;  %640 = vmatpush1.bf16.msra.mxu1 %v603_v44  ;;  %v221_v44 = vld [vmem:[#allocation2 + $0x1e0] sm:$0xff] }
  0x4b   :  { %605 = vmatprep.subr.bf16.mxu0 %v701_v0  ;;  %625 = vmatprep.subr.bf16.mxu1 %v701_v0 }
  0x4e   :  { %607 = vmatpush1.bf16.msra.mxu0 %v606_v47  ;;  %641 = vmatpush1.bf16.msra.mxu1 %v606_v47  ;;  %v191_v47 = vld [vmem:[#allocation2 + $0xf0] sm:$0xff] }
  0x4f   :  { %608 = vmatprep.subr.bf16.mxu0 %v701_v0  ;;  %626 = vmatprep.subr.bf16.mxu1 %v701_v0  ;;  %v199_v0 = vld [vmem:[#allocation2 + $0x130] sm:$0xff] }
  0x52   :  { %610 = vmatpush1.bf16.msra.mxu0 %v609_v50  ;;  %642 = vmatpush1.bf16.msra.mxu1 %v609_v50  ;;  %v49_v50 = vld [vmem:[%s975_s2 + $0x80] sm:$0xff] }
  0x55   :  { %322 = vmatmul.mubr.f32.vlgmr.msra.gmra.mrb[0].mxu0 %v161_v51  ;;  %402 = vmatmul.mubr.f32.vlgmr.msra.gmra.mrb[0].mxu1 %v193_v52  ;;  %v65_v51 = vmul.f32 -1.0, %v33_v49  ;;  %v81_v52 = vmul.f32 -1.0, %v49_v50  ;;  %v40_v49 = vld [vmem:[%s975_s2 + $0x38] sm:$0xff] }
  0x56   :  { %326 = vmatprep.mubr.f32.mxu0 %v164_v53  ;;  %406 = vmatprep.mubr.f32.mxu1 %v196_v54  ;;  %v34_v53 = vld [vmem:[%s975_s2 + $0x8] sm:$0xff]  ;;  %v56_v50 = vld [vmem:[%s975_s2 + $0xb8] sm:$0xff] }
  0x57   :  { %v50_v54 = vld [vmem:[%s975_s2 + $0x88] sm:$0xff] }
  0x59   :  { %327 = vmatmul.mubr.f32.gmra.mrb[2].mxu0 %v163_v55  ;;  %407 = vmatmul.mubr.f32.gmra.mrb[2].mxu1 %v195_v56 }
  0x5a   :  { %331 = vmatprep.mubr.f32.mxu0 %v166_v57  ;;  %411 = vmatprep.mubr.f32.mxu1 %v198_v58 }
  0x5d   :  { %332 = vmatmul.mubr.f32.gmra.mrb[4].mxu0 %v165_v59  ;;  %412 = vmatmul.mubr.f32.gmra.mrb[4].mxu1 %v197_v60 }
  0x5e   :  { %336 = vmatprep.mubr.f32.mxu0 %v168_v61  ;;  %416 = vmatprep.mubr.f32.mxu1 %v200_v62  ;;  %v66_v61 = vmul.f32 -1.0, %v34_v53  ;;  %v82_v62 = vmul.f32 -1.0, %v50_v54 }
  0x61   :  { %337 = vmatmul.mubr.f32.gmra.mrb[6].mxu0 %v167_v63  ;;  %417 = vmatmul.mubr.f32.gmra.mrb[6].mxu1 %v199_v0  ;;  %v35_v63 = vld [vmem:[%s975_s2 + $0x10] sm:$0xff] }
  0x62   :  { %341 = vmatprep.mubr.f32.mxu0 %v170_v1  ;;  %421 = vmatprep.mubr.f32.mxu1 %v202_v2  ;;  %v51_v0 = vld [vmem:[%s975_s2 + $0x90] sm:$0xff] }
  0x65   :  { %342 = vmatmul.mubr.f32.gmra.mrb[8].mxu0 %v169_v3  ;;  %422 = vmatmul.mubr.f32.gmra.mrb[8].mxu1 %v201_v4 }
  0x66   :  { %346 = vmatprep.mubr.f32.mxu0 %v172_v5  ;;  %426 = vmatprep.mubr.f32.mxu1 %v204_v6 }
  0x69   :  { %347 = vmatmul.mubr.f32.gmra.mrb[10].mxu0 %v171_v7  ;;  %427 = vmatmul.mubr.f32.gmra.mrb[10].mxu1 %v203_v8  ;;  %v67_v7 = vmul.f32 -1.0, %v35_v63  ;;  %v83_v8 = vmul.f32 -1.0, %v51_v0 }
  0x6a   :  { %351 = vmatprep.mubr.f32.mxu0 %v174_v9  ;;  %431 = vmatprep.mubr.f32.mxu1 %v206_v10  ;;  %v36_v9 = vld [vmem:[%s975_s2 + $0x18] sm:$0xff] }
  0x6b   :  { %v52_v10 = vld [vmem:[%s975_s2 + $0x98] sm:$0xff] }
  0x6d   :  { %352 = vmatmul.mubr.f32.gmra.mrb[12].mxu0 %v173_v11  ;;  %432 = vmatmul.mubr.f32.gmra.mrb[12].mxu1 %v205_v12 }
  0x6e   :  { %356 = vmatprep.mubr.f32.mxu0 %v176_v13  ;;  %436 = vmatprep.mubr.f32.mxu1 %v208_v14 }
  0x71   :  { %357 = vmatmul.mubr.f32.gmra.mrb[14].mxu0 %v175_v15  ;;  %437 = vmatmul.mubr.f32.gmra.mrb[14].mxu1 %v207_v16 }
  0x72   :  { %361 = vmatprep.mubr.f32.mxu0 %v178_v17  ;;  %441 = vmatprep.mubr.f32.mxu1 %v210_v18  ;;  %v68_v17 = vmul.f32 -1.0, %v36_v9  ;;  %v84_v18 = vmul.f32 -1.0, %v52_v10 }
  0x75   :  { %362 = vmatmul.mubr.f32.gmra.mrb[16].mxu0 %v177_v19  ;;  %442 = vmatmul.mubr.f32.gmra.mrb[16].mxu1 %v209_v20  ;;  %v37_v19 = vld [vmem:[%s975_s2 + $0x20] sm:$0xff] }
  0x76   :  { %366 = vmatprep.mubr.f32.mxu0 %v180_v21  ;;  %446 = vmatprep.mubr.f32.mxu1 %v212_v22  ;;  %v53_v20 = vld [vmem:[%s975_s2 + $0xa0] sm:$0xff] }
  0x79   :  { %367 = vmatmul.mubr.f32.gmra.mrb[18].mxu0 %v179_v23  ;;  %447 = vmatmul.mubr.f32.gmra.mrb[18].mxu1 %v211_v24 }
  0x7a   :  { %371 = vmatprep.mubr.f32.mxu0 %v182_v25  ;;  %451 = vmatprep.mubr.f32.mxu1 %v214_v26 }
  0x7d   :  { %372 = vmatmul.mubr.f32.gmra.mrb[20].mxu0 %v181_v27  ;;  %452 = vmatmul.mubr.f32.gmra.mrb[20].mxu1 %v213_v28  ;;  %v69_v27 = vmul.f32 -1.0, %v37_v19  ;;  %v85_v28 = vmul.f32 -1.0, %v53_v20 }
  0x7e   :  { %376 = vmatprep.mubr.f32.mxu0 %v184_v29  ;;  %456 = vmatprep.mubr.f32.mxu1 %v216_v30  ;;  %v38_v29 = vld [vmem:[%s975_s2 + $0x28] sm:$0xff] }
  0x7f   :  { %v54_v30 = vld [vmem:[%s975_s2 + $0xa8] sm:$0xff] }
  0x81   :  { %377 = vmatmul.mubr.f32.gmra.mrb[22].mxu0 %v183_v31  ;;  %457 = vmatmul.mubr.f32.gmra.mrb[22].mxu1 %v215_v32 }
  0x82   :  { %381 = vmatprep.mubr.f32.mxu0 %v186_v33  ;;  %461 = vmatprep.mubr.f32.mxu1 %v218_v34 }
  0x85   :  { %382 = vmatmul.mubr.f32.gmra.mrb[24].mxu0 %v185_v35  ;;  %462 = vmatmul.mubr.f32.gmra.mrb[24].mxu1 %v217_v36 }
  0x86   :  { %386 = vmatprep.mubr.f32.mxu0 %v188_v37  ;;  %466 = vmatprep.mubr.f32.mxu1 %v220_v38  ;;  %v70_v37 = vmul.f32 -1.0, %v38_v29  ;;  %v86_v38 = vmul.f32 -1.0, %v54_v30 }
  0x89   :  { %387 = vmatmul.mubr.f32.gmra.mrb[26].mxu0 %v187_v39  ;;  %467 = vmatmul.mubr.f32.gmra.mrb[26].mxu1 %v219_v40  ;;  %v39_v39 = vld [vmem:[%s975_s2 + $0x30] sm:$0xff] }
  0x8a   :  { %391 = vmatprep.mubr.f32.mxu0 %v190_v41  ;;  %471 = vmatprep.mubr.f32.mxu1 %v222_v42  ;;  %v55_v40 = vld [vmem:[%s975_s2 + $0xb0] sm:$0xff] }
  0x8d   :  { %392 = vmatmul.mubr.f32.gmra.mrb[28].mxu0 %v189_v43  ;;  %472 = vmatmul.mubr.f32.gmra.mrb[28].mxu1 %v221_v44 }
  0x8e   :  { %396 = vmatprep.mubr.f32.mxu0 %v192_v45  ;;  %476 = vmatprep.mubr.f32.mxu1 %v224_v46 }
  0x91   :  { %397 = vmatmul.mubr.f32.gmra.mrb[30].mxu0 %v191_v47  ;;  %477 = vmatmul.mubr.f32.gmra.mrb[30].mxu1 %v223_v48  ;;  %v71_v47 = vmul.f32 -1.0, %v39_v39  ;;  %v87_v48 = vmul.f32 -1.0, %v55_v40 }
 0x128   :  { %v323_v55 = vpop.f32.mrb[0].mxu0  ;;  %v403_v56 = vpop.f32.mrb[0].mxu1 }
 0x129   :  { %v482_v57 = vadd.f32 %v323_v55, %v65_v51  ;;  %v498_v58 = vadd.f32 %v403_v56, %v81_v52  ;;  %v325_v59 = vpop.f32.mrb[1].mxu0  ;;  %v405_v60 = vpop.f32.mrb[1].mxu1 }
 0x12a   :  { %v41_v59 = vld [vmem:[%s975_s2 + $0x40] sm:$0xff] }
 0x12b   :  { %514 = vst [vmem:[#allocation5] sm:$0xff] %v482_v57  ;;  %530 = vst [vmem:[#allocation5 + $0x80] sm:$0xff] %v498_v58  ;;  %v72_v57 = vmul.f32 -1.0, %v40_v49  ;;  %v88_v58 = vmul.f32 -1.0, %v56_v50  ;;  %v57_v60 = vld [vmem:[%s975_s2 + $0xc0] sm:$0xff] }
 0x12c   :  { %v328_v1 = vpop.f32.mrb[2].mxu0  ;;  %v408_v2 = vpop.f32.mrb[2].mxu1 }
 0x12d   :  { %v483_v3 = vadd.f32 %v328_v1, %v66_v61  ;;  %v499_v4 = vadd.f32 %v408_v2, %v82_v62  ;;  %v330_v5 = vpop.f32.mrb[3].mxu0  ;;  %v410_v6 = vpop.f32.mrb[3].mxu1 }
 0x12e   :  { %v42_v5 = vld [vmem:[%s975_s2 + $0x48] sm:$0xff] }
 0x12f   :  { %515 = vst [vmem:[#allocation5 + $0x8] sm:$0xff] %v483_v3  ;;  %531 = vst [vmem:[#allocation5 + $0x88] sm:$0xff] %v499_v4  ;;  %v73_v3 = vmul.f32 -1.0, %v41_v59  ;;  %v89_v4 = vmul.f32 -1.0, %v57_v60  ;;  %v58_v6 = vld [vmem:[%s975_s2 + $0xc8] sm:$0xff] }
 0x130   :  { %v333_v11 = vpop.f32.mrb[4].mxu0  ;;  %v413_v12 = vpop.f32.mrb[4].mxu1 }
 0x131   :  { %v484_v13 = vadd.f32 %v333_v11, %v67_v7  ;;  %v500_v14 = vadd.f32 %v413_v12, %v83_v8  ;;  %v335_v15 = vpop.f32.mrb[5].mxu0  ;;  %v415_v16 = vpop.f32.mrb[5].mxu1 }
 0x132   :  { %v43_v15 = vld [vmem:[%s975_s2 + $0x50] sm:$0xff] }
 0x133   :  { %516 = vst [vmem:[#allocation5 + $0x10] sm:$0xff] %v484_v13  ;;  %532 = vst [vmem:[#allocation5 + $0x90] sm:$0xff] %v500_v14  ;;  %v74_v13 = vmul.f32 -1.0, %v42_v5  ;;  %v90_v14 = vmul.f32 -1.0, %v58_v6  ;;  %v59_v16 = vld [vmem:[%s975_s2 + $0xd0] sm:$0xff] }
 0x134   :  { %v338_v21 = vpop.f32.mrb[6].mxu0  ;;  %v418_v22 = vpop.f32.mrb[6].mxu1 }
 0x135   :  { %v485_v23 = vadd.f32 %v338_v21, %v68_v17  ;;  %v501_v24 = vadd.f32 %v418_v22, %v84_v18  ;;  %v340_v25 = vpop.f32.mrb[7].mxu0  ;;  %v420_v26 = vpop.f32.mrb[7].mxu1 }
 0x136   :  { %v44_v25 = vld [vmem:[%s975_s2 + $0x58] sm:$0xff] }
 0x137   :  { %517 = vst [vmem:[#allocation5 + $0x18] sm:$0xff] %v485_v23  ;;  %533 = vst [vmem:[#allocation5 + $0x98] sm:$0xff] %v501_v24  ;;  %v75_v23 = vmul.f32 -1.0, %v43_v15  ;;  %v91_v24 = vmul.f32 -1.0, %v59_v16  ;;  %v60_v26 = vld [vmem:[%s975_s2 + $0xd8] sm:$0xff] }
 0x138   :  { %v343_v31 = vpop.f32.mrb[8].mxu0  ;;  %v423_v32 = vpop.f32.mrb[8].mxu1 }
 0x139   :  { %v486_v33 = vadd.f32 %v343_v31, %v69_v27  ;;  %v502_v34 = vadd.f32 %v423_v32, %v85_v28  ;;  %v345_v35 = vpop.f32.mrb[9].mxu0  ;;  %v425_v36 = vpop.f32.mrb[9].mxu1 }
 0x13a   :  { %v45_v35 = vld [vmem:[%s975_s2 + $0x60] sm:$0xff] }
 0x13b   :  { %518 = vst [vmem:[#allocation5 + $0x20] sm:$0xff] %v486_v33  ;;  %534 = vst [vmem:[#allocation5 + $0xa0] sm:$0xff] %v502_v34  ;;  %v76_v33 = vmul.f32 -1.0, %v44_v25  ;;  %v92_v34 = vmul.f32 -1.0, %v60_v26  ;;  %v61_v36 = vld [vmem:[%s975_s2 + $0xe0] sm:$0xff] }
 0x13c   :  { %v348_v41 = vpop.f32.mrb[10].mxu0  ;;  %v428_v42 = vpop.f32.mrb[10].mxu1 }
 0x13d   :  { %v487_v43 = vadd.f32 %v348_v41, %v70_v37  ;;  %v503_v44 = vadd.f32 %v428_v42, %v86_v38  ;;  %v350_v45 = vpop.f32.mrb[11].mxu0  ;;  %v430_v46 = vpop.f32.mrb[11].mxu1 }
 0x13e   :  { %v46_v45 = vld [vmem:[%s975_s2 + $0x68] sm:$0xff] }
 0x13f   :  { %519 = vst [vmem:[#allocation5 + $0x28] sm:$0xff] %v487_v43  ;;  %535 = vst [vmem:[#allocation5 + $0xa8] sm:$0xff] %v503_v44  ;;  %v77_v43 = vmul.f32 -1.0, %v45_v35  ;;  %v93_v44 = vmul.f32 -1.0, %v61_v36  ;;  %v62_v46 = vld [vmem:[%s975_s2 + $0xe8] sm:$0xff] }
 0x140   :  { %v353_v51 = vpop.f32.mrb[12].mxu0  ;;  %v433_v52 = vpop.f32.mrb[12].mxu1 }
 0x141   :  { %v488_v53 = vadd.f32 %v353_v51, %v71_v47  ;;  %v504_v54 = vadd.f32 %v433_v52, %v87_v48  ;;  %v355_v55 = vpop.f32.mrb[13].mxu0  ;;  %v435_v56 = vpop.f32.mrb[13].mxu1 }
 0x142   :  { %v47_v55 = vld [vmem:[%s975_s2 + $0x70] sm:$0xff] }
 0x143   :  { %520 = vst [vmem:[#allocation5 + $0x30] sm:$0xff] %v488_v53  ;;  %536 = vst [vmem:[#allocation5 + $0xb0] sm:$0xff] %v504_v54  ;;  %v78_v53 = vmul.f32 -1.0, %v46_v45  ;;  %v94_v54 = vmul.f32 -1.0, %v62_v46  ;;  %v63_v56 = vld [vmem:[%s975_s2 + $0xf0] sm:$0xff] }
 0x144   :  { %v358_v61 = vpop.f32.mrb[14].mxu0  ;;  %v438_v62 = vpop.f32.mrb[14].mxu1 }
 0x145   :  { %v489_v63 = vadd.f32 %v358_v61, %v72_v57  ;;  %v505_v0 = vadd.f32 %v438_v62, %v88_v58  ;;  %v360_v1 = vpop.f32.mrb[15].mxu0  ;;  %v440_v2 = vpop.f32.mrb[15].mxu1 }
 0x146   :  { %v48_v1 = vld [vmem:[%s975_s2 + $0x78] sm:$0xff] }
 0x147   :  { %521 = vst [vmem:[#allocation5 + $0x38] sm:$0xff] %v489_v63  ;;  %537 = vst [vmem:[#allocation5 + $0xb8] sm:$0xff] %v505_v0  ;;  %v79_v63 = vmul.f32 -1.0, %v47_v55  ;;  %v95_v0 = vmul.f32 -1.0, %v63_v56  ;;  %v64_v2 = vld [vmem:[%s975_s2 + $0xf8] sm:$0xff]  ;;  %s672_s2 = scalar_lea.vmem %s552_s12, 4096 }
 0x148   :  { %v363_v7 = vpop.f32.mrb[16].mxu0  ;;  %v443_v8 = vpop.f32.mrb[16].mxu1  ;;  %p673_p8 = scmp.ne.s32.totalorder %s552_s12, %s672_s2  ;;  %p678_p10 = scmp.lt.s32.totalorder %s672_s2, %s672_s2 }
 0x149   :  { %v490_v9 = vadd.f32 %v363_v7, %v73_v3  ;;  %v506_v10 = vadd.f32 %v443_v8, %v89_v4  ;;  %v365_v11 = vpop.f32.mrb[17].mxu0  ;;  %v445_v12 = vpop.f32.mrb[17].mxu1 }
 0x14a   :  { %p679_p11 = por %p678_p10, %p677_p9 }
 0x14b   :  { %522 = vst [vmem:[#allocation5 + $0x40] sm:$0xff] %v490_v9  ;;  %538 = vst [vmem:[#allocation5 + $0xc0] sm:$0xff] %v506_v10  ;;  %v80_v9 = vmul.f32 -1.0, %v48_v1  ;;  %v96_v10 = vmul.f32 -1.0, %v64_v2 }
 0x14c   :  { %v368_v17 = vpop.f32.mrb[18].mxu0  ;;  %v448_v18 = vpop.f32.mrb[18].mxu1  ;;  %p680_p12 = pnand %p679_p11, %p673_p8 }
 0x14d   :  { %v491_v19 = vadd.f32 %v368_v17, %v74_v13  ;;  %v507_v20 = vadd.f32 %v448_v18, %v90_v14  ;;  %v370_v21 = vpop.f32.mrb[19].mxu0  ;;  %v450_v22 = vpop.f32.mrb[19].mxu1 }
 0x14f   :  { %523 = vst [vmem:[#allocation5 + $0x48] sm:$0xff] %v491_v19  ;;  %539 = vst [vmem:[#allocation5 + $0xc8] sm:$0xff] %v507_v20 }
 0x150   :  { %v373_v27 = vpop.f32.mrb[20].mxu0  ;;  %v453_v28 = vpop.f32.mrb[20].mxu1 }
 0x151   :  { %v492_v29 = vadd.f32 %v373_v27, %v75_v23  ;;  %v508_v30 = vadd.f32 %v453_v28, %v91_v24  ;;  %v375_v31 = vpop.f32.mrb[21].mxu0  ;;  %v455_v32 = vpop.f32.mrb[21].mxu1 }
 0x153   :  { %524 = vst [vmem:[#allocation5 + $0x50] sm:$0xff] %v492_v29  ;;  %540 = vst [vmem:[#allocation5 + $0xd0] sm:$0xff] %v508_v30 }
 0x154   :  { %v378_v37 = vpop.f32.mrb[22].mxu0  ;;  %v458_v38 = vpop.f32.mrb[22].mxu1 }
 0x155   :  { %v493_v39 = vadd.f32 %v378_v37, %v76_v33  ;;  %v509_v40 = vadd.f32 %v458_v38, %v92_v34  ;;  %v380_v41 = vpop.f32.mrb[23].mxu0  ;;  %v460_v42 = vpop.f32.mrb[23].mxu1 }
 0x157   :  { %525 = vst [vmem:[#allocation5 + $0x58] sm:$0xff] %v493_v39  ;;  %541 = vst [vmem:[#allocation5 + $0xd8] sm:$0xff] %v509_v40 }
 0x158   :  { %v383_v47 = vpop.f32.mrb[24].mxu0  ;;  %v463_v48 = vpop.f32.mrb[24].mxu1 }
 0x159   :  { %v494_v49 = vadd.f32 %v383_v47, %v77_v43  ;;  %v510_v50 = vadd.f32 %v463_v48, %v93_v44  ;;  %v385_v51 = vpop.f32.mrb[25].mxu0  ;;  %v465_v52 = vpop.f32.mrb[25].mxu1 }
 0x15b   :  { %526 = vst [vmem:[#allocation5 + $0x60] sm:$0xff] %v494_v49  ;;  %542 = vst [vmem:[#allocation5 + $0xe0] sm:$0xff] %v510_v50 }
 0x15c   :  { %v388_v57 = vpop.f32.mrb[26].mxu0  ;;  %v468_v58 = vpop.f32.mrb[26].mxu1 }
 0x15d   :  { %v495_v59 = vadd.f32 %v388_v57, %v78_v53  ;;  %v511_v60 = vadd.f32 %v468_v58, %v94_v54  ;;  %v390_v61 = vpop.f32.mrb[27].mxu0  ;;  %v470_v62 = vpop.f32.mrb[27].mxu1 }
 0x15f   :  { %527 = vst [vmem:[#allocation5 + $0x68] sm:$0xff] %v495_v59  ;;  %543 = vst [vmem:[#allocation5 + $0xe8] sm:$0xff] %v511_v60 }
 0x160   :  { %v393_v3 = vpop.f32.mrb[28].mxu0  ;;  %v473_v4 = vpop.f32.mrb[28].mxu1 }
 0x161   :  { %v496_v5 = vadd.f32 %v393_v3, %v79_v63  ;;  %v512_v6 = vadd.f32 %v473_v4, %v95_v0  ;;  %v395_v7 = vpop.f32.mrb[29].mxu0  ;;  %v475_v8 = vpop.f32.mrb[29].mxu1 }
 0x163   :  { %528 = vst [vmem:[#allocation5 + $0x70] sm:$0xff] %v496_v5  ;;  %544 = vst [vmem:[#allocation5 + $0xf0] sm:$0xff] %v512_v6 }
 0x164   :  { %v398_v11 = vpop.f32.mrb[30].mxu0  ;;  %v478_v12 = vpop.f32.mrb[30].mxu1 }
 0x165   :  { %v497_v13 = vadd.f32 %v398_v11, %v80_v9  ;;  %v513_v14 = vadd.f32 %v478_v12, %v96_v10  ;;  %v400_v15 = vpop.f32.mrb[31].mxu0  ;;  %v480_v16 = vpop.f32.mrb[31].mxu1 }
 0x167   :  { %529 = vst [vmem:[#allocation5 + $0x78] sm:$0xff] %v497_v13  ;;  %545 = vst [vmem:[#allocation5 + $0xf8] sm:$0xff] %v513_v14 }
 0x168   :  { %683 = shalt.err (!%p680_p12)
}
 0x169   :  { %s684_s15 = scalar_lea.hbm %s976_s3, 4096 }
 0x16a   :  { %p685_p13 = scmp.ne.s32.totalorder %s976_s3, %s684_s15  ;;  %p688_p0 = scmp.lt.u32.totalorder %s684_s15, %s976_s3 }
 0x16c   :  { %p690_p1 = pnand %p688_p0, %p685_p13 }
 0x16e   :  { %693 = shalt.err (!%p690_p1)
}
 0x16f   :  { %s703_s20 = smov 128   ;;  %s704_s21 = smov 8  }
 0x170   :  { %557 = dma.vmem_to_hbm [thread:$0]  %s552_s12, 4096, %s976_s3, [#allocation4], %s703_s20, %s703_s20, %s704_s21  }
 0x171   :  { %696 = dma.done.wait [#allocation4], 4096  }
 0x172   :  { %697 = vsyncadd [#allocation4], 4294963200 }
 0x173   :  { %561 = vsyncpa [#allocation3], 1 }
 0x174   :  { %562 = vsyncpa [#allocation4], 1 }

</bundles_post_ra>
